<compile_context>
chip_gen: v7x
topology: tpu7x:2x2x1
jax: 0.10.0
libtpu: 0.0.40
codegen_flags: <defaults>
</compile_context>

<pallas_src>
import functools

import jax
import jax.numpy as jnp
from jax.experimental import pallas as pl
from jax.experimental.pallas import tpu as pltpu


# ----------------------------------------------------------------------------
# Kernels
# ----------------------------------------------------------------------------
def _layernorm_kernel(x_ref, g_ref, b_ref, o_ref, *, eps):
    # x_ref: (tm, F)   g_ref/b_ref: (1, F)   o_ref: (tm, F)
    x = x_ref[...].astype(jnp.float32)
    f = x.shape[-1]
    mean = jnp.mean(x, axis=-1, keepdims=True)
    xc = x - mean
    # torch.Tensor.std() is the unbiased estimator (N-1 denominator).
    var = jnp.sum(xc * xc, axis=-1, keepdims=True) * (1.0 / jnp.float32(f - 1))
    std = jnp.sqrt(var)
    y = g_ref[...].astype(jnp.float32) * xc / (std + eps) \
        + b_ref[...].astype(jnp.float32)
    o_ref[...] = y.astype(o_ref.dtype)


def _residual_kernel(x_ref, s_ref, o_ref):
    # o = x + dropout(s); eval-mode dropout is identity.
    # TODO(synk): training-mode (inverted Bernoulli) dropout is not applied.
    o_ref[...] = (x_ref[...].astype(jnp.float32)
                  + s_ref[...].astype(jnp.float32)).astype(o_ref.dtype)


# ----------------------------------------------------------------------------
# Wrappers
# ----------------------------------------------------------------------------
def _round_up(n, m):
    return ((n + m - 1) // m) * m


def _row_tiling(m, tm):
    """Pick an (8-aligned) effective row tile and the padded row count."""
    tm_eff = min(tm, _round_up(m, 8))
    tm_eff = max(8, _round_up(tm_eff, 8))
    m_pad = _round_up(m, tm_eff)
    return tm_eff, m_pad


def _vmem_budget(n_row_bufs, tm, f, itemsize):
    # n_row_bufs (tm, f) tiles, double-buffered, plus a few MiB of headroom.
    need = 2 * n_row_bufs * tm * f * itemsize + (4 << 20)
    return int(min(64 << 20, max(need, 8 << 20)))


def layer_norm_2d(x2d, gain, bias, *, eps=1e-6, tm=256):
    """LayerNorm over the last dim of a (rows, features) matrix."""
    m, f = x2d.shape
    tm_eff, m_pad = _row_tiling(m, tm)
    xp = jnp.pad(x2d, ((0, m_pad - m), (0, 0))) if m_pad != m else x2d
    g2 = gain.reshape(1, f).astype(x2d.dtype)
    b2 = bias.reshape(1, f).astype(x2d.dtype)
    itemsize = jnp.dtype(x2d.dtype).itemsize

    out = pl.pallas_call(
        functools.partial(_layernorm_kernel, eps=eps),
        out_shape=jax.ShapeDtypeStruct((m_pad, f), x2d.dtype),
        grid_spec=pltpu.PrefetchScalarGridSpec(
            num_scalar_prefetch=0,
            grid=(m_pad // tm_eff,),
            in_specs=[
                pl.BlockSpec((tm_eff, f), lambda i: (i, 0)),   # x tile
                pl.BlockSpec((1, f), lambda i: (0, 0)),        # gain (resident)
                pl.BlockSpec((1, f), lambda i: (0, 0)),        # bias (resident)
            ],
            out_specs=pl.BlockSpec((tm_eff, f), lambda i: (i, 0)),
        ),
        compiler_params=pltpu.CompilerParams(
            dimension_semantics=("parallel",),
            vmem_limit_bytes=_vmem_budget(2, tm_eff, f, itemsize)),
    )(xp, g2, b2)
    return out[:m] if m_pad != m else out


def residual_add_2d(x2d, s2d, *, tm=256):
    """x + s over (rows, features) matrices (eval-mode dropout == identity)."""
    m, f = x2d.shape
    tm_eff, m_pad = _row_tiling(m, tm)
    pad = m_pad - m
    xp = jnp.pad(x2d, ((0, pad), (0, 0))) if pad else x2d
    sp = jnp.pad(s2d, ((0, pad), (0, 0))) if pad else s2d
    itemsize = jnp.dtype(x2d.dtype).itemsize

    out = pl.pallas_call(
        _residual_kernel,
        out_shape=jax.ShapeDtypeStruct((m_pad, f), x2d.dtype),
        grid_spec=pltpu.PrefetchScalarGridSpec(
            num_scalar_prefetch=0,
            grid=(m_pad // tm_eff,),
            in_specs=[
                pl.BlockSpec((tm_eff, f), lambda i: (i, 0)),
                pl.BlockSpec((tm_eff, f), lambda i: (i, 0)),
            ],
            out_specs=pl.BlockSpec((tm_eff, f), lambda i: (i, 0)),
        ),
        compiler_params=pltpu.CompilerParams(
            dimension_semantics=("parallel",),
            vmem_limit_bytes=_vmem_budget(3, tm_eff, f, itemsize)),
    )(xp, sp)
    return out[:m] if pad else out


def sublayer_connection(x, gain, bias, sublayer, *, eps=1e-6, tm=256):
    """y = x + dropout(sublayer(LayerNorm(x))).  x: (..., features)."""
    shape = x.shape
    f = shape[-1]
    x2d = x.reshape(-1, f)
    normed = layer_norm_2d(x2d, gain, bias, eps=eps, tm=tm).reshape(shape)
    s = sublayer(normed)                     # arbitrary JAX callable
    out2d = residual_add_2d(x2d, s.reshape(-1, f), tm=tm)
    return out2d.reshape(shape)


# ----------------------------------------------------------------------------
# Demo / self-test
# ----------------------------------------------------------------------------
if __name__ == "__main__":
    batch, seq, size = 2, 8, 128      # size multiple of 128 -> lane-dense tiles
    eps = 1e-6

    key = jax.random.PRNGKey(0)
    kx, kg, kb, kw, kwb = jax.random.split(key, 5)

    x = jax.random.normal(kx, (batch, seq, size), jnp.float32)
    # LayerNorm params (PyTorch init is ones/zeros; perturb to exercise math).
    gain = 1.0 + 0.1 * jax.random.normal(kg, (size,), jnp.float32)
    bias = 0.1 * jax.random.normal(kb, (size,), jnp.float32)

    # A representative sublayer: a small linear layer (plain JAX).
    bound = 1.0 / jnp.sqrt(size)
    W = jax.random.uniform(kw, (size, size), jnp.float32, -bound, bound)
    wb = jax.random.uniform(kwb, (size,), jnp.float32, -bound, bound)
    sublayer = lambda h: h @ W + wb

    out = sublayer_connection(x, gain, bias, sublayer, eps=eps)
    out = jax.block_until_ready(out)

    # Pure-JAX reference (eval-mode dropout = identity; torch-style unbiased std).
    mean = x.mean(-1, keepdims=True)
    std = jnp.std(x, axis=-1, keepdims=True, ddof=1)
    normed_ref = gain * (x - mean) / (std + eps) + bias
    ref = x + (normed_ref @ W + wb)

    assert out.shape == (batch, seq, size)
    assert jnp.allclose(out, ref, atol=1e-4, rtol=1e-4), float(
        jnp.max(jnp.abs(out - ref)))

    print("KERNEL_OK")
</pallas_src>

<mosaic_0001>
module attributes {stable_mosaic.version = 11 : i64} {
  func.func @_layernorm_kernel(%arg0: i32, %arg1: memref<16x128xf32, #tpu.memory_space<vmem>>, %arg2: memref<1x128xf32, #tpu.memory_space<vmem>>, %arg3: memref<1x128xf32, #tpu.memory_space<vmem>>, %arg4: memref<16x128xf32, #tpu.memory_space<vmem>>) attributes {dimension_semantics = [#tpu.dimension_semantics<parallel>], iteration_bounds = array<i64: 1>, scalar_prefetch = 0 : i64, scratch_operands = 0 : i64, tpu.core_type = #tpu.core_type<tc>, window_params = [{transform_indices = @transform_0, window_bounds = array<i64: 16, 128>}, {pipeline_mode = #tpu.pipeline_mode<synchronous>, transform_indices = @transform_1, window_bounds = array<i64: 1, 128>}, {pipeline_mode = #tpu.pipeline_mode<synchronous>, transform_indices = @transform_2, window_bounds = array<i64: 1, 128>}, {transform_indices = @transform_3, window_bounds = array<i64: 16, 128>}]} {
    %c0 = arith.constant 0 : index
    %c0_0 = arith.constant 0 : index
    %0 = vector.load %arg1[%c0, %c0_0] : memref<16x128xf32, #tpu.memory_space<vmem>>, vector<16x128xf32>
    %cst = arith.constant dense<0.000000e+00> : vector<16xf32>
    %1 = vector.multi_reduction <add>, %0, %cst [1] : vector<16x128xf32> to vector<16xf32>
    %2 = vector.shape_cast %1 : vector<16xf32> to vector<16x1xf32>
    %cst_1 = arith.constant 1.280000e+02 : f32
    %3 = vector.broadcast %cst_1 : f32 to vector<16x1xf32>
    %4 = arith.divf %2, %3 : vector<16x1xf32>
    %5 = vector.broadcast %4 : vector<16x1xf32> to vector<16x128xf32>
    %6 = arith.subf %0, %5 : vector<16x128xf32>
    %7 = arith.mulf %6, %6 : vector<16x128xf32>
    %cst_2 = arith.constant dense<0.000000e+00> : vector<16xf32>
    %8 = vector.multi_reduction <add>, %7, %cst_2 [1] : vector<16x128xf32> to vector<16xf32>
    %9 = vector.shape_cast %8 : vector<16xf32> to vector<16x1xf32>
    %cst_3 = arith.constant 1.000000e+00 : f32
    %cst_4 = arith.constant 1.270000e+02 : f32
    %10 = arith.divf %cst_3, %cst_4 : f32
    %11 = vector.broadcast %10 : f32 to vector<16x1xf32>
    %12 = arith.mulf %9, %11 : vector<16x1xf32>
    %13 = math.sqrt %12 : vector<16x1xf32>
    %c0_5 = arith.constant 0 : index
    %c0_6 = arith.constant 0 : index
    %14 = vector.load %arg2[%c0_5, %c0_6] : memref<1x128xf32, #tpu.memory_space<vmem>>, vector<1x128xf32>
    %15 = vector.broadcast %14 : vector<1x128xf32> to vector<16x128xf32>
    %16 = arith.mulf %15, %6 : vector<16x128xf32>
    %cst_7 = arith.constant 9.99999997E-7 : f32
    %17 = vector.broadcast %cst_7 : f32 to vector<16x1xf32>
    %18 = arith.addf %13, %17 : vector<16x1xf32>
    %19 = vector.broadcast %18 : vector<16x1xf32> to vector<16x128xf32>
    %20 = arith.divf %16, %19 : vector<16x128xf32>
    %c0_8 = arith.constant 0 : index
    %c0_9 = arith.constant 0 : index
    %21 = vector.load %arg3[%c0_8, %c0_9] : memref<1x128xf32, #tpu.memory_space<vmem>>, vector<1x128xf32>
    %22 = vector.broadcast %21 : vector<1x128xf32> to vector<16x128xf32>
    %23 = arith.addf %20, %22 : vector<16x128xf32>
    %c0_10 = arith.constant 0 : index
    %c0_11 = arith.constant 0 : index
    %24 = vector.load %arg4[%c0_10, %c0_11] : memref<16x128xf32, #tpu.memory_space<vmem>>, vector<16x128xf32>
    tpu.vector_store %arg4[%c0_10, %c0_11], %23 {strides = array<i32>} : memref<16x128xf32, #tpu.memory_space<vmem>>, vector<16x128xf32>,
    return
  }
  func.func @transform_0(%arg0: i32) -> (i32, i32) {
    %c0_i32 = arith.constant 0 : i32
    %c0_i32_0 = arith.constant 0 : i32
    return %arg0, %c0_i32 : i32, i32
  }
  func.func @transform_1(%arg0: i32) -> (i32, i32) {
    %c0_i32 = arith.constant 0 : i32
    %c0_i32_0 = arith.constant 0 : i32
    %c0_i32_1 = arith.constant 0 : i32
    return %c0_i32, %c0_i32_0 : i32, i32
  }
  func.func @transform_2(%arg0: i32) -> (i32, i32) {
    %c0_i32 = arith.constant 0 : i32
    %c0_i32_0 = arith.constant 0 : i32
    %c0_i32_1 = arith.constant 0 : i32
    return %c0_i32, %c0_i32_0 : i32, i32
  }
  func.func @transform_3(%arg0: i32) -> (i32, i32) {
    %c0_i32 = arith.constant 0 : i32
    %c0_i32_0 = arith.constant 0 : i32
    return %arg0, %c0_i32 : i32, i32
  }
}

</mosaic_0001>

<bundles_post_ra>
// kernel: tpu_custom_call.1
= control target key start
LH: loop header
LB: loop body
LE: loop exit
PB: predicated region body
PF: predicated region fallthrough
CT: control target
= control target key end

     0   :  { %8 = vsyncpa [#allocation3], 0  ;;  %s227_s0 = inlined_call_operand.hbm [shape: f32[16,128], index: 0, kind: input, shape index: {}]   ;;  %s228_s1 = inlined_call_operand.vmem [shape: f32[1,128], index: 1, kind: input, shape index: {}]   ;;  %s229_s2 = inlined_call_operand.vmem [shape: f32[1,128], index: 2, kind: input, shape index: {}]   ;;  %s230_s3 = inlined_call_operand.hbm [shape: f32[16,128], index: 3, kind: output, shape index: {}]  }
   0x1   :  { %9 = vsyncpa [#allocation4], 0  ;;  %s167_s12 = smov [#allocation2]   ;;  %s119_s16 = scalar_lea.hbm %s227_s0, 256 }
   0x2   :  { %s15_s13 = sshll.u32 %s167_s12, 4  ;;  %p120_p0 = scmp.ne.s32.totalorder %s227_s0, %s119_s16  ;;  %s16_s13 = int_to_ptr.vmem [resolvable:$true] %s15_s13 }
   0x3   :  { %p123_p1 = scmp.lt.u32.totalorder %s119_s16, %s227_s0 }
   0x5   :  { %p125_p2 = pnand %p123_p1, %p120_p0 }
   0x7   :  { %128 = shalt.err (!%p125_p2)
}
   0x8   :  { %s129_s21 = scalar_lea.vmem %s16_s13, 256  ;;  %p134_p4 = scmp.lt.s32.totalorder %s16_s13, %s16_s13 }
   0x9   :  { %p130_p3 = scmp.ne.s32.totalorder %s16_s13, %s129_s21  ;;  %p135_p5 = scmp.lt.s32.totalorder %s129_s21, %s129_s21 }
   0xb   :  { %p136_p6 = por %p135_p5, %p134_p4 }
   0xd   :  { %p137_p7 = pnand %p136_p6, %p130_p3 }
   0xf   :  { %140 = shalt.err (!%p137_p7)
}
  0x10   :  { %s168_s22 = smov 128   ;;  %s169_s23 = smov 8  }
  0x11   :  { %21 = dma.hbm_to_vmem [thread:$0]  %s227_s0, 256, %s16_s13, [#allocation3], %s168_s22, %s168_s22, %s169_s23  }
  0x12   :  { %163 = dma.done.wait [#allocation3], 256  }
  0x13   :  { %164 = vsyncadd [#allocation3], 4294967040  ;;  %v29_v0 = vld [vmem:[#allocation2] sm:$0xff]  ;;  %v30_v1 = vld [vmem:[#allocation2 + $0x8] sm:$0xff]  ;;  %s170_s29 = smov [#allocation5]  }
  0x14   :  { %31 = vadd.xlane.f32.xlu0 %v29_v0  ;;  %v105_v26 = vld [vmem:[%s228_s1] ss:$0 sm:$0xff]  ;;  %s93_s30 = sshll.u32 %s170_s29, 4  ;;  %s94_s30 = int_to_ptr.vmem [resolvable:$true] %s93_s30 }
  0x15   :  { %v106_v29 = vld [vmem:[%s229_s2] ss:$0 sm:$0xff]  ;;  %s141_s4 = scalar_lea.vmem %s94_s30, 256  ;;  %p146_p9 = scmp.lt.s32.totalorder %s94_s30, %s94_s30 }
  0x16   :  { %p142_p8 = scmp.ne.s32.totalorder %s94_s30, %s141_s4  ;;  %p147_p10 = scmp.lt.s32.totalorder %s141_s4, %s141_s4 }
  0x18   :  { %33 = vadd.xlane.f32.xlu0 %v30_v1  ;;  %p148_p11 = por %p147_p10, %p146_p9 }
  0x1a   :  { %p149_p12 = pnand %p148_p11, %p142_p8 }
  0xa1   :  { %v32_v2 = vpop.xlane.xlu0 %31 }
  0xa2   :  { %v36_v3 = vmul.f32 0.0078125, %v32_v2 }
  0xa4   :  { %v38_v4 = vsub.f32 %v29_v0, %v36_v3 }
  0xa5   :  { %v34_v5 = vpop.xlane.xlu0 %33 }
  0xa6   :  { %v37_v6 = vmul.f32 0.0078125, %v34_v5  ;;  %v40_v7 = vmul.f32 %v38_v4, %v38_v4  ;;  %v69_v27 = vmul.f32 %v105_v26, %v38_v4 }
  0xa8   :  { %v39_v8 = vsub.f32 %v30_v1, %v37_v6  ;;  %42 = vadd.xlane.f32.xlu1 %v40_v7 }
  0xaa   :  { %v41_v9 = vmul.f32 %v39_v8, %v39_v8  ;;  %v70_v31 = vmul.f32 %v105_v26, %v39_v8 }
  0xac   :  { %44 = vadd.xlane.f32.xlu1 %v41_v9 }
 0x135   :  { %v43_v10 = vpop.xlane.xlu1 %42 }
 0x136   :  { %v46_v11 = vmul.f32 0.007874016, %v43_v10 }
 0x138   :  { %111 = vrsqrt.f32 %v46_v11  ;;  %vm50_vm0 = vcmp.eq.f32.partialorder %v46_v11, inf  ;;  %v53_v16 = vand.u32 2147483648, %v46_v11  ;;  %vm52_vm1 = vcmp.eq.f32.partialorder %v46_v11, 0.0 }
 0x139   :  { %v45_v12 = vpop.xlane.xlu1 %44 }
 0x13a   :  { %v47_v13 = vmul.f32 0.007874016, %v45_v12 }
 0x13c   :  { %113 = vrsqrt.f32 %v47_v13  ;;  %vm57_vm2 = vcmp.eq.f32.partialorder %v47_v13, inf  ;;  %v60_v22 = vand.u32 2147483648, %v47_v13  ;;  %vm59_vm3 = vcmp.eq.f32.partialorder %v47_v13, 0.0 }
 0x142   :  { %v112_v14 = vpop.eup %111 }
 0x143   :  { %v49_v15 = vmul.f32 %v112_v14, %v46_v11 }
 0x145   :  { %v51_v17 = vsel %vm50_vm0, %v46_v11, %v49_v15 }
 0x146   :  { %v114_v18 = vpop.eup %113  ;;  %v54_v19 = vsel %vm52_vm1, %v53_v16, %v51_v17 }
 0x147   :  { %v56_v20 = vmul.f32 %v114_v18, %v47_v13  ;;  %v71_v21 = vadd.f32 1e-06, %v54_v19 }
 0x149   :  { %v58_v23 = vsel %vm57_vm2, %v47_v13, %v56_v20  ;;  %115 = vrcp.f32 %v71_v21 }
 0x14a   :  { %v61_v24 = vsel %vm59_vm3, %v60_v22, %v58_v23 }
 0x14b   :  { %v72_v25 = vadd.f32 1e-06, %v61_v24 }
 0x14d   :  { %117 = vrcp.f32 %v72_v25 }
 0x153   :  { %v116_v28 = vpop.eup %115 }
 0x154   :  { %v74_v30 = vmul.f32 %v116_v28, %v69_v27 }
 0x156   :  { %v84_v32 = vadd.f32 %v106_v29, %v74_v30 }
 0x157   :  { %v118_v33 = vpop.eup %117 }
 0x158   :  { %v76_v34 = vmul.f32 %v118_v33, %v70_v31  ;;  %86 = vst [vmem:[#allocation5] sm:$0xff] %v84_v32 }
 0x15a   :  { %v85_v35 = vadd.f32 %v106_v29, %v76_v34 }
 0x15c   :  { %87 = vst [vmem:[#allocation5 + $0x8] sm:$0xff] %v85_v35 }
 0x15d   :  { %152 = shalt.err (!%p149_p12)
}
 0x15e   :  { %s153_s5 = scalar_lea.hbm %s230_s3, 256 }
 0x15f   :  { %p154_p13 = scmp.ne.s32.totalorder %s230_s3, %s153_s5  ;;  %p157_p0 = scmp.lt.u32.totalorder %s153_s5, %s230_s3 }
 0x161   :  { %p159_p1 = pnand %p157_p0, %p154_p13 }
 0x163   :  { %162 = shalt.err (!%p159_p1)
}
 0x164   :  { %99 = dma.vmem_to_hbm [thread:$0]  %s94_s30, 256, %s230_s3, [#allocation4], %s168_s22, %s168_s22, %s169_s23  }
 0x165   :  { %165 = dma.done.wait [#allocation4], 256  }
 0x166   :  { %166 = vsyncadd [#allocation4], 4294967040 }
 0x167   :  { %103 = vsyncpa [#allocation3], 1 }
 0x168   :  { %104 = vsyncpa [#allocation4], 1 }

</bundles_post_ra>
